<compile_context>
chip_gen: v6e
topology: v6e:2x2x1
jax: 0.10.0
libtpu: 0.0.40
codegen_flags: <defaults>
</compile_context>

<pallas_src>
import math
import functools

import jax
import jax.numpy as jnp
from jax.experimental import pallas as pl
from jax.experimental.pallas import tpu as pltpu


def _semantic_attention_kernel(x_ref, w_ref, b_ref, o_ref, *, bt, s, e):
    # x_ref: (bt, S, E) batch tile; w_ref: (3, E, E); b_ref: (3, 1, E);
    # o_ref: (bt, 1, S*E) lane-dense output slab.
    x = x_ref[...]                                   # native dtype (f32 / bf16)
    xf = x.reshape(bt * s, e)                        # merge leading dims (free)

    def proj(idx):
        # Leading-dim (non-lane) slice of the stacked weight/bias: a free view.
        w = w_ref[idx]                               # (E, E)
        b = b_ref[idx].astype(jnp.float32)           # (1, E)
        y = jnp.dot(xf, w, preferred_element_type=jnp.float32) + b
        return y.reshape(bt, s, e)                   # split leading dims (free)

    q = proj(0)                                      # 1/sqrt(E) folded into wq/bq
    k = proj(1)
    v = proj(2)

    # Scores: batched contraction over the embed dim (no explicit K^T transpose).
    sc = jnp.einsum("bqe,bke->bqk", q, k,
                    preferred_element_type=jnp.float32)          # (bt, S, S)

    # Numerically stable softmax; normalization deferred past the PV matmul.
    m = jnp.max(sc, axis=-1, keepdims=True)
    p = jnp.exp(sc - m)
    denom = jnp.sum(p, axis=-1, keepdims=True)                   # (bt, S, 1)

    out = jnp.einsum("bqk,bke->bqe", p, v,
                     preferred_element_type=jnp.float32)         # (bt, S, E)
    out = out * pl.reciprocal(denom, approx=False)

    # Lane-dense store: (bt, 1, S*E) with S*E a multiple of 128.
    o_ref[...] = out.reshape(bt, 1, s * e).astype(o_ref.dtype)


def _pick_batch_tile(batch, seq, target_rows=256):
    # Pack enough rows per grid step to amortize the ~0.35us per-step overhead
    # (target Bt*S >= target_rows), but keep the grid length >= 2 whenever
    # possible so the "parallel" batch axis can be split across v7x's 2 TCs.
    bt = max(1, -(-target_rows // max(seq, 1)))       # ceil(target / S)
    if batch >= 2:
        bt = min(bt, -(-batch // 2))                  # grid length >= 2
    return max(1, min(bt, batch))


def semantic_attention(x, wq, wk, wv, bq, bk, bv, *, batch_tile=None):
    """x: (B, S, E); w*: (E, E) stored pre-transposed (in, out); b*: (E,)."""
    B, S, E = x.shape
    scale = 1.0 / math.sqrt(E)

    bt = batch_tile or _pick_batch_tile(B, S)
    grid_b = pl.cdiv(B, bt)
    b_pad = grid_b * bt
    x_in = x if b_pad == B else jnp.pad(x, ((0, b_pad - B), (0, 0), (0, 0)))

    # Stack (not concatenate) projections so in-kernel Q/K/V selection is a free
    # leading-dim slice; fold 1/sqrt(E) into the Q projection once, here.
    w_qkv = jnp.stack([wq * scale, wk, wv], axis=0).astype(x.dtype)        # (3, E, E)
    b_qkv = jnp.stack([bq * scale, bk, bv], axis=0).reshape(3, 1, E)       # (3, 1, E)
    b_qkv = b_qkv.astype(jnp.float32)

    kernel = functools.partial(_semantic_attention_kernel, bt=bt, s=S, e=E)

    cost = pl.CostEstimate(
        flops=2 * b_pad * S * E * 3 * E + 4 * b_pad * S * S * E,
        transcendentals=b_pad * S * S,
        bytes_accessed=(2 * b_pad * S * E + 3 * E * E + 3 * E)
        * jnp.dtype(x.dtype).itemsize,
    )

    # TODO(synk): for large E, tile the QKV matmul over the output/K dims and set
    # vmem_limit_bytes against v7x's 64 MiB VMEM; for large S, switch to a
    # flash-style KV-tiled online softmax (grid axis "arbitrary", VMEM scratch
    # accumulators) instead of materializing the (S, S) score matrix.
    out_flat = pl.pallas_call(
        kernel,
        out_shape=jax.ShapeDtypeStruct((b_pad, 1, S * E), x.dtype),
        grid_spec=pltpu.PrefetchScalarGridSpec(
            num_scalar_prefetch=0,
            grid=(grid_b,),
            in_specs=[
                pl.BlockSpec((bt, S, E), lambda i: (i, 0, 0)),        # x batch tile
                pl.BlockSpec((3, E, E), lambda i: (0, 0, 0),          # stacked W (resident)
                             pipeline_mode=pl.Buffered(1)),
                pl.BlockSpec((3, 1, E), lambda i: (0, 0, 0),          # stacked b (resident)
                             pipeline_mode=pl.Buffered(1)),
            ],
            out_specs=pl.BlockSpec((bt, 1, S * E), lambda i: (i, 0, 0)),
        ),
        compiler_params=pltpu.CompilerParams(
            dimension_semantics=("parallel",)),
        cost_estimate=cost,
    )(x_in, w_qkv, b_qkv)

    out = out_flat.reshape(b_pad, S, E)
    return out[:B] if b_pad != B else out


def semantic_attention_ref(x, wq, wk, wv, bq, bk, bv):
    """Pure-JAX reference matching the PyTorch forward."""
    q = x @ wq + bq
    k = x @ wk + bk
    v = x @ wv + bv
    s = jnp.einsum("bse,bte->bst", q, k) / math.sqrt(x.shape[-1])
    attn = jax.nn.softmax(s, axis=-1)
    return jnp.einsum("bst,bte->bse", attn, v)


if __name__ == "__main__":
    B, S, E = 2, 8, 32  # batch, seq, embed_size

    key = jax.random.PRNGKey(0)
    kx, kq, kk, kv, kbq, kbk, kbv = jax.random.split(key, 7)

    x = jax.random.normal(kx, (B, S, E), dtype=jnp.float32)

    # Deterministic parameter init (PyTorch Linear default-ish uniform range),
    # weights stored pre-transposed: (E_in, E_out).
    bound = 1.0 / math.sqrt(E)
    wq = jax.random.uniform(kq, (E, E), minval=-bound, maxval=bound, dtype=jnp.float32)
    wk = jax.random.uniform(kk, (E, E), minval=-bound, maxval=bound, dtype=jnp.float32)
    wv = jax.random.uniform(kv, (E, E), minval=-bound, maxval=bound, dtype=jnp.float32)
    bq = jax.random.uniform(kbq, (E,), minval=-bound, maxval=bound, dtype=jnp.float32)
    bk = jax.random.uniform(kbk, (E,), minval=-bound, maxval=bound, dtype=jnp.float32)
    bv = jax.random.uniform(kbv, (E,), minval=-bound, maxval=bound, dtype=jnp.float32)

    out = semantic_attention(x, wq, wk, wv, bq, bk, bv)
    out = jax.block_until_ready(out)

    ref = semantic_attention_ref(x, wq, wk, wv, bq, bk, bv)
    assert out.shape == ref.shape, "shape mismatch vs reference"
    assert jnp.allclose(out, ref, atol=2e-4, rtol=2e-4), "mismatch vs reference"

    print("KERNEL_OK")
</pallas_src>

<mosaic_0001>
module attributes {stable_mosaic.version = 11 : i64} {
  func.func @_semantic_attention_kernel(%arg0: i32, %arg1: memref<1x8x32xf32, #tpu.memory_space<vmem>>, %arg2: memref<3x32x32xf32, #tpu.memory_space<vmem>>, %arg3: memref<3x1x32xf32, #tpu.memory_space<vmem>>, %arg4: memref<1x1x256xf32, #tpu.memory_space<vmem>>) attributes {dimension_semantics = [#tpu.dimension_semantics<parallel>], iteration_bounds = array<i64: 2>, scalar_prefetch = 0 : i64, scratch_operands = 0 : i64, tpu.core_type = #tpu.core_type<tc>, window_params = [{transform_indices = @transform_0, window_bounds = array<i64: 1, 8, 32>}, {pipeline_mode = #tpu.pipeline_mode<synchronous>, transform_indices = @transform_1, window_bounds = array<i64: 3, 32, 32>}, {pipeline_mode = #tpu.pipeline_mode<synchronous>, transform_indices = @transform_2, window_bounds = array<i64: 3, 1, 32>}, {transform_indices = @transform_3, window_bounds = array<i64: 1, 1, 256>}]} {
    %c0 = arith.constant 0 : index
    %c0_0 = arith.constant 0 : index
    %c0_1 = arith.constant 0 : index
    %0 = vector.load %arg1[%c0, %c0_0, %c0_1] : memref<1x8x32xf32, #tpu.memory_space<vmem>>, vector<1x8x32xf32>
    %1 = vector.shape_cast %0 : vector<1x8x32xf32> to vector<8x32xf32>
    %c0_2 = arith.constant 0 : index
    %c0_3 = arith.constant 0 : index
    %c0_4 = arith.constant 0 : index
    %2 = vector.load %arg2[%c0_2, %c0_3, %c0_4] : memref<3x32x32xf32, #tpu.memory_space<vmem>>, vector<1x32x32xf32>
    %3 = vector.shape_cast %2 : vector<1x32x32xf32> to vector<32x32xf32>
    %c0_5 = arith.constant 0 : index
    %c0_6 = arith.constant 0 : index
    %c0_7 = arith.constant 0 : index
    %4 = vector.load %arg3[%c0_5, %c0_6, %c0_7] : memref<3x1x32xf32, #tpu.memory_space<vmem>>, vector<1x1x32xf32>
    %5 = vector.shape_cast %4 : vector<1x1x32xf32> to vector<1x32xf32>
    %cst = arith.constant dense<0.000000e+00> : vector<8x32xf32>
    %6 = tpu.matmul %1, %3, %cst {dimension_numbers = #tpu.dot_dimension_numbers<[1], [0], [0], [1], [0, 0, 1, 1], [], []>} : vector<8x32xf32>, vector<32x32xf32>, vector<8x32xf32> -> vector<8x32xf32>
    %7 = vector.broadcast %5 : vector<1x32xf32> to vector<8x32xf32>
    %8 = arith.addf %6, %7 : vector<8x32xf32>
    %9 = vector.shape_cast %8 : vector<8x32xf32> to vector<1x8x32xf32>
    %c1 = arith.constant 1 : index
    %c0_8 = arith.constant 0 : index
    %c0_9 = arith.constant 0 : index
    %10 = vector.load %arg2[%c1, %c0_8, %c0_9] : memref<3x32x32xf32, #tpu.memory_space<vmem>>, vector<1x32x32xf32>
    %11 = vector.shape_cast %10 : vector<1x32x32xf32> to vector<32x32xf32>
    %c1_10 = arith.constant 1 : index
    %c0_11 = arith.constant 0 : index
    %c0_12 = arith.constant 0 : index
    %12 = vector.load %arg3[%c1_10, %c0_11, %c0_12] : memref<3x1x32xf32, #tpu.memory_space<vmem>>, vector<1x1x32xf32>
    %13 = vector.shape_cast %12 : vector<1x1x32xf32> to vector<1x32xf32>
    %cst_13 = arith.constant dense<0.000000e+00> : vector<8x32xf32>
    %14 = tpu.matmul %1, %11, %cst_13 {dimension_numbers = #tpu.dot_dimension_numbers<[1], [0], [0], [1], [0, 0, 1, 1], [], []>} : vector<8x32xf32>, vector<32x32xf32>, vector<8x32xf32> -> vector<8x32xf32>
    %15 = vector.broadcast %13 : vector<1x32xf32> to vector<8x32xf32>
    %16 = arith.addf %14, %15 : vector<8x32xf32>
    %17 = vector.shape_cast %16 : vector<8x32xf32> to vector<1x8x32xf32>
    %c2 = arith.constant 2 : index
    %c0_14 = arith.constant 0 : index
    %c0_15 = arith.constant 0 : index
    %18 = vector.load %arg2[%c2, %c0_14, %c0_15] : memref<3x32x32xf32, #tpu.memory_space<vmem>>, vector<1x32x32xf32>
    %19 = vector.shape_cast %18 : vector<1x32x32xf32> to vector<32x32xf32>
    %c2_16 = arith.constant 2 : index
    %c0_17 = arith.constant 0 : index
    %c0_18 = arith.constant 0 : index
    %20 = vector.load %arg3[%c2_16, %c0_17, %c0_18] : memref<3x1x32xf32, #tpu.memory_space<vmem>>, vector<1x1x32xf32>
    %21 = vector.shape_cast %20 : vector<1x1x32xf32> to vector<1x32xf32>
    %cst_19 = arith.constant dense<0.000000e+00> : vector<8x32xf32>
    %22 = tpu.matmul %1, %19, %cst_19 {dimension_numbers = #tpu.dot_dimension_numbers<[1], [0], [0], [1], [0, 0, 1, 1], [], []>} : vector<8x32xf32>, vector<32x32xf32>, vector<8x32xf32> -> vector<8x32xf32>
    %23 = vector.broadcast %21 : vector<1x32xf32> to vector<8x32xf32>
    %24 = arith.addf %22, %23 : vector<8x32xf32>
    %25 = vector.shape_cast %24 : vector<8x32xf32> to vector<1x8x32xf32>
    "tpu.trace_start"() <{level = 10 : i32, message = "bqe,bke->bqk"}> : () -> ()
    %cst_20 = arith.constant dense<0.000000e+00> : vector<1x8x8xf32>
    %26 = tpu.matmul %9, %17, %cst_20 {dimension_numbers = #tpu.dot_dimension_numbers<[2], [2], [1], [1], [0, 0, 0, 1, 1, 1], [0], [0]>} : vector<1x8x32xf32>, vector<1x8x32xf32>, vector<1x8x8xf32> -> vector<1x8x8xf32>
    "tpu.trace_stop"() : () -> ()
    %cst_21 = arith.constant dense<0xFF800000> : vector<1x8xf32>
    %27 = vector.multi_reduction <maximumf>, %26, %cst_21 [2] : vector<1x8x8xf32> to vector<1x8xf32>
    %28 = vector.shape_cast %27 : vector<1x8xf32> to vector<1x8x1xf32>
    %29 = vector.broadcast %28 : vector<1x8x1xf32> to vector<1x8x8xf32>
    %30 = arith.subf %26, %29 : vector<1x8x8xf32>
    %31 = math.exp %30 : vector<1x8x8xf32>
    %cst_22 = arith.constant dense<0.000000e+00> : vector<1x8xf32>
    %32 = vector.multi_reduction <add>, %31, %cst_22 [2] : vector<1x8x8xf32> to vector<1x8xf32>
    %33 = vector.shape_cast %32 : vector<1x8xf32> to vector<1x8x1xf32>
    "tpu.trace_start"() <{level = 10 : i32, message = "bqk,bke->bqe"}> : () -> ()
    %cst_23 = arith.constant dense<0.000000e+00> : vector<1x8x32xf32>
    %34 = tpu.matmul %31, %25, %cst_23 {dimension_numbers = #tpu.dot_dimension_numbers<[2], [1], [1], [2], [0, 0, 0, 1, 1, 2], [0], [0]>} : vector<1x8x8xf32>, vector<1x8x32xf32>, vector<1x8x32xf32> -> vector<1x8x32xf32>
    "tpu.trace_stop"() : () -> ()
    %35 = tpu.reciprocal %33 : vector<1x8x1xf32> -> vector<1x8x1xf32>
    %36 = vector.broadcast %35 : vector<1x8x1xf32> to vector<1x8x32xf32>
    %37 = arith.mulf %34, %36 : vector<1x8x32xf32>
    %38 = vector.shape_cast %37 : vector<1x8x32xf32> to vector<1x1x256xf32>
    %c0_24 = arith.constant 0 : index
    %c0_25 = arith.constant 0 : index
    %c0_26 = arith.constant 0 : index
    %39 = vector.load %arg4[%c0_24, %c0_25, %c0_26] : memref<1x1x256xf32, #tpu.memory_space<vmem>>, vector<1x1x256xf32>
    tpu.vector_store %arg4[%c0_24, %c0_25, %c0_26], %38 {strides = array<i32>} : memref<1x1x256xf32, #tpu.memory_space<vmem>>, vector<1x1x256xf32>,
    return
  }
  func.func @transform_0(%arg0: i32) -> (i32, i32, i32) {
    %c0_i32 = arith.constant 0 : i32
    %c0_i32_0 = arith.constant 0 : i32
    %c0_i32_1 = arith.constant 0 : i32
    return %arg0, %c0_i32, %c0_i32_0 : i32, i32, i32
  }
  func.func @transform_1(%arg0: i32) -> (i32, i32, i32) {
    %c0_i32 = arith.constant 0 : i32
    %c0_i32_0 = arith.constant 0 : i32
    %c0_i32_1 = arith.constant 0 : i32
    %c0_i32_2 = arith.constant 0 : i32
    return %c0_i32, %c0_i32_0, %c0_i32_1 : i32, i32, i32
  }
  func.func @transform_2(%arg0: i32) -> (i32, i32, i32) {
    %c0_i32 = arith.constant 0 : i32
    %c0_i32_0 = arith.constant 0 : i32
    %c0_i32_1 = arith.constant 0 : i32
    %c0_i32_2 = arith.constant 0 : i32
    return %c0_i32, %c0_i32_0, %c0_i32_1 : i32, i32, i32
  }
  func.func @transform_3(%arg0: i32) -> (i32, i32, i32) {
    %c0_i32 = arith.constant 0 : i32
    %c0_i32_0 = arith.constant 0 : i32
    %c0_i32_1 = arith.constant 0 : i32
    return %arg0, %c0_i32, %c0_i32_0 : i32, i32, i32
  }
}

</mosaic_0001>

<bundles_post_ra>
// kernel: tpu_custom_call.1
= control target key start
LH: loop header
LB: loop body
LE: loop exit
PB: predicated region body
PF: predicated region fallthrough
CT: control target
= control target key end

     0   :  { %8 = vsyncpa [#allocation3], 0  ;;  %s1335_s0 = inlined_call_operand.hbm [shape: f32[2,8,32], index: 0, kind: input, shape index: {}]   ;;  %s1336_s1 = inlined_call_operand.hbm [shape: f32[3,32,32], index: 1, kind: input, shape index: {}]   ;;  %s1337_s2 = inlined_call_operand.vmem [shape: f32[3,1,32], index: 2, kind: input, shape index: {}]   ;;  %s1338_s3 = inlined_call_operand.hbm [shape: f32[2,1,256], index: 3, kind: output, shape index: {}]  }
   0x1   :  { %10 = vsyncpa [#allocation3 + $0x1], 0 }
   0x2   :  { %11 = vsyncpa [#allocation6], 0 }
   0x3   :  { %12 = vsyncpa [#allocation4], 0 }
   0x4   :  { %14 = vsyncpa [#allocation4 + $0x1], 0  ;;  %s1130_s12 = smov 0   ;;  %s1132_s13 = smov 0  }
   0x5   :  { %s1134_s14 = smov 0   ;;  %s1136_s15 = smov 0  }
   0x6 LB: > { %s1151_s16 = sadd.s32 4294967295, %s1095_s15   ;;  %s813_s17 = sadd.s32 4294967294, %s1095_s15   ;;  %s1095_s15 = sphi %s1136_s15, %s1360_s15   ;;  %s1091_s14 = sphi %s1134_s14, %s1359_s14   ;;  %s1087_s13 = sphi %s1132_s13, %s1358_s13   ;;  %s1083_s12 = sphi %s1130_s12, %s1357_s12  }
   0x7   : > { %p40_p0 = scmp.ne.s32.totalorder %s1087_s13, %s1083_s12  ;;  %p1339_p1 = scmp.eq.s32.totalorder %s1151_s16, 0 }
   0x8   : > { %p112_p3 = scmp.eq.s32.totalorder %s813_s17, 1  ;;  %p814_p5 = scmp.ge.s32.totalorder %s1095_s15, 1 }
   0x9   : > { %p1160_p4 = por %p1339_p1, %p40_p0  ;;  %p119_p7 = scmp.lt.s32.totalorder %s1095_s15, 3 }
   0xa   : > { %p1165_p6 = por %p112_p3, %p40_p0  ;;  %s1097_s21 = smov [#allocation5]  }
   0xb   : > { %s1343_s18 = scalar_select %p1160_p4, 1, 0 }
   0xc   : > { %s1344_s19 = scalar_select %p1165_p6, 1, 0 }
   0xd   : > { %p1170_p8 = pnand %p814_p5, %p119_p7  ;;  %s131_s22 = sshll.u32 %s1097_s21, 4  ;;  %s132_s22 = int_to_ptr.vmem [resolvable:$true] %s131_s22 }
   0xe   : > { %s1184_s24 = sadd.s32 1, %s1095_s15   ;;  %s27_s25 = sadd.s32 1, %s1091_s14 }
   0xf   : > { %s1345_s20 = scalar_select %p1170_p8, 1, 0 }
  0x10   : > { %p910_p9 = pneg %p1170_p8  ;;  %s24_s26 = ssub.s32 %s1095_s15, %s1184_s24 }
  0x11   : > { %s984_s27 = scalar_lea.vmem %s132_s22, 1536  ;;  %p992_p5 = scmp.lt.s32.totalorder %s132_s22, %s132_s22 }
  0x12   : > { %p1179_p11 = pnand %p910_p9, %p1339_p1  ;;  %p985_p13 = scmp.ne.s32.totalorder %s132_s22, %s984_s27 }
  0x13   : > { %p993_p7 = scmp.lt.s32.totalorder %s984_s27, %s984_s27 }
  0x14   : > { %p975_p12 = pneg %p1179_p11 }
  0x15   : > { %p994_p10 = por %p993_p7, %p992_p5 }
  0x16   : > { %p987_p0 = pnand %p985_p13, %p975_p12 }
  0x18   : > { %p988_p3 = pneg %p987_p0 }
  0x1a   : > { %p995_p2 = pnand %p994_p10, %p988_p3 }
  0x1c   : > { %998 = shalt.err (!%p995_p2)
}
  0x1d   : > { %s1098_s28 = smov 128   ;;  %s1099_s29 = smov 8  }
  0x1e   : > { %913 = dma.hbm_to_vmem [thread:$0]  (!%p1179_p11), %s1336_s1, 1536, %s132_s22, [#allocation6], %s1098_s28, %s1098_s28, %s1099_s29  }
  0x1f   : > { %p25_p9 = scmp.eq.s32.totalorder %s24_s26, 0  ;;  %p34_p12 = scmp.ne.s32.totalorder %s1091_s14, %s1087_s13 }
  0x20   : > { %p35_p10 = scmp.eq.s32.totalorder %s1095_s15, 0  ;;  %p923_p2 = scmp.lt.s32.totalorder %s1095_s15, 2 }
  0x21   : > { %s1201_s5 = scalar_select %p25_p9, %s1091_s14, %s27_s25  }
  0x22   : > { %p36_p13 = por %p35_p10, %p34_p12  ;;  %p1347_p0 = scmp.eq.s32.totalorder %s1151_s16, 1 }
  0x23   : > { %s148_s7 = sand.u32 1, %s1091_s14   ;;  %s818_s8 = sshll.u32 %s1095_s15, 7 }
  0x24   : > { %p1205_p3 = por %p1347_p0, %p34_p12  ;;  %s817_s9 = sshll.u32 %s148_s7, 3 }
  0x25   : > { %s1214_s17 = scalar_lea.hbm %s1335_s0, %s818_s8  ;;  %s152_s21 = scalar_lea.vmem [#allocation2], %s817_s9 }
  0x26   : > { %s1348_s6 = scalar_select %p1205_p3, 1, 0 }
  0x27   : > { %s159_s22 = sshll.u32 %s152_s21, 4  ;;  %p1216_p11 = pnand %p923_p2, %p36_p13  ;;  %s160_s22 = int_to_ptr.vmem [resolvable:$true] %s159_s22 }
  0x28   : > { %s149_s25 = scalar_lea.sflag [#allocation3], %s148_s7  ;;  %s999_s26 = scalar_lea.hbm %s1214_s17, 128 }
  0x29   : > { %p1000_p5 = scmp.ne.s32.totalorder %s1214_s17, %s999_s26  ;;  %p1001_p7 = pneg %p1216_p11 }
  0x2a   : > { %s1004_s29 = scalar_lea.hbm %s1335_s0, 256  ;;  %p1005_p10 = scmp.lt.s32.totalorder %s1214_s17, %s1335_s0 }
  0x2b   : > { %p1002_p9 = pnand %p1001_p7, %p1000_p5  ;;  %p1006_p2 = scmp.lt.s32.totalorder %s1004_s29, %s999_s26 }
  0x2d   : > { %p1003_p12 = pneg %p1002_p9  ;;  %p1007_p13 = por %p1006_p2, %p1005_p10 }
  0x2f   : > { %p1008_p0 = pnand %p1007_p13, %p1003_p12 }
  0x31   : > { %1011 = shalt.err (!%p1008_p0)
}
  0x32   : > { %s1012_s8 = scalar_lea.vmem %s160_s22, 128  ;;  %s1100_s7 = smov [#allocation2]  }
  0x33   : > { %p1013_p1 = scmp.ne.s32.totalorder %s160_s22, %s1012_s8  ;;  %s1017_s9 = sshll.u32 %s1100_s7, 4  ;;  %s1018_s9 = int_to_ptr.vmem [resolvable:$false] %s1017_s9 }
  0x34   : > { %s1019_s10 = scalar_lea.vmem %s1018_s9, 256  ;;  %p1020_p5 = scmp.lt.s32.totalorder %s160_s22, %s1018_s9 }
  0x35   : > { %p1015_p6 = pnand %p1013_p1, %p1001_p7  ;;  %p1021_p9 = scmp.lt.s32.totalorder %s1019_s10, %s1012_s8 }
  0x37   : > { %p1016_p3 = pneg %p1015_p6  ;;  %p1022_p4 = por %p1021_p9, %p1020_p5 }
  0x39   : > { %p1023_p8 = pnand %p1022_p4, %p1016_p3 }
  0x3b   : > { %1026 = shalt.err (!%p1023_p8)
}
  0x3c   : > { %917 = dma.hbm_to_vmem [thread:$0]  (!%p1216_p11), %s1214_s17, 128, %s160_s22, %s149_s25  }
  0x3d   : > { %p1350_p12 = scmp.ne.s32.totalorder %s1345_s20, 0 }
  0x3e   : > { %s1237_s11 = sand.u32 (!%p1350_p12), 1, %s1087_s13   ;;  %p1351_p1 = scmp.ne.s32.totalorder (!%p1350_p12), %s1343_s18, 0 }
  0x3f   : > { %168 = sbr.rel (%p1350_p12) target bundleno = 982 (0x3d6), region = 32  ;;  %s820_s21 = sshll.u32 (!%p1350_p12), %s1237_s11, 3 }
  0x40   : > { %s171_s26 = scalar_lea.sflag (!%p1350_p12), [#allocation3], %s1237_s11  ;;  %s174_s27 = scalar_lea.vmem (!%p1350_p12), [#allocation2], %s820_s21 }
  0x44   : > { %1070 = dma.done.wait (%p1351_p1), %s171_s26, 128  }
  0x45   : > { %1072 = vsyncadd (%p1351_p1), %s171_s26, 4294967168  ;;  %p1352_p4 = scmp.eq.s32.totalorder %s1151_s16, 0 }
  0x47   : > { %1074 = dma.done.wait (%p1352_p4), [#allocation6], 1536   ;;  %p1353_p6 = pmov %p1352_p4 }
  0x48   : > { %v1101_v0 = vmov 0.0   ;;  %vm1102_vm0 = vmmov 0   ;;  %v291_v1 = vld [vmem:[#allocation5 + $0x38] sm:$0xff]  ;;  %v290_v3 = vld [vmem:[#allocation5 + $0x30] sm:$0xff]  ;;  %v289_v5 = vld [vmem:[#allocation5 + $0x28] sm:$0xff]  ;;  %vm213_vm1 = vcmask 261120   ;;  %v618_v37 = vlaneseq }
  0x49   : > { %1076 = vsyncadd (%p1353_p6), [#allocation6], 4294965760  ;;  %870 = vmatprep.subr.mxu1 %v1101_v0  ;;  %859 = vmatprep.subr.mxu0 %v1101_v0  ;;  %v205_v2 = vld [vmem:[#allocation5 + $0x18] sm:$0xff]  ;;  %v204_v4 = vld [vmem:[#allocation5 + $0x10] sm:$0xff]  ;;  %vm529_vm2 = vcmask 64512   ;;  %s1105_s28 = smov 32  }
  0x4a   : > { %878 = vmatprep.mubr.msk.f32.mxu1 %vm1102_vm0, %v1101_v0  ;;  %867 = vmatprep.mubr.msk.f32.mxu0 %vm1102_vm0, %v1101_v0  ;;  %v203_v6 = vld [vmem:[#allocation5 + $0x8] sm:$0xff]  ;;  %v288_v7 = vld [vmem:[#allocation5 + $0x20] sm:$0xff]  ;;  %v201_v9 = vld [vmem:[%s174_s27] sm:$0xff]  ;;  %v1103_v35 = vmov 1983009808   ;;  %v619_v41 = vshrl.u32 %v618_v37, 7 }
  0x4b   : > { %871 = vmatpush3.msra.mxu1 %v291_v1  ;;  %860 = vmatpush3.msra.mxu0 %v205_v2  ;;  %v202_v8 = vld [vmem:[#allocation5] sm:$0xff]  ;;  %v374_v10 = vld [vmem:[#allocation5 + $0x58] sm:$0xff]  ;;  %v373_v11 = vld [vmem:[#allocation5 + $0x50] sm:$0xff]  ;;  %v616_v36 = vunpack.c.l.s4 %v1103_v35  ;;  %v1104_v38 = vmov 1934713408   ;;  %s1106_s29 = smov 64  }
  0x4c   : > { %872 = vmatprep.subr.mxu1 %v1101_v0  ;;  %861 = vmatprep.subr.mxu0 %v1101_v0  ;;  %v372_v12 = vld [vmem:[#allocation5 + $0x48] sm:$0xff]  ;;  %v371_v13 = vld [vmem:[#allocation5 + $0x40] sm:$0xff]  ;;  %v826_v14 = vld [vmem:[%s1337_s2 + $0x1] ss:$0 sm:$0xff]  ;;  %v631_v39 = vunpack.c.l.s4 %v1104_v38  ;;  %s1107_s30 = smov 96   ;;  %vm688_vm3 = vcmask 523264  }
  0x4d   : > { %873 = vmatpush3.msra.mxu1 %v290_v3  ;;  %862 = vmatpush3.msra.mxu0 %v204_v4  ;;  %v823_v15 = vld [vmem:[%s1337_s2] ss:$0 sm:$0xff]  ;;  %v829_v25 = vld [vmem:[%s1337_s2 + $0x2] ss:$0 sm:$0xff]  ;;  %v617_v40 = vunpack.c.0.s8 %v616_v36  ;;  %v1108_v2 = vmov 1966171168  }
  0x4e   : > { %874 = vmatprep.subr.mxu1 %v1101_v0  ;;  %863 = vmatprep.subr.mxu0 %v1101_v0  ;;  %v632_v42 = vunpack.c.0.s8 %v631_v39  ;;  %v699_v3 = vunpack.c.l.s4 %v1108_v2  ;;  %s822_s4 = sshll.u32 %s1237_s11, 1  ;;  %vm690_vm4 = vcmask 785408   ;;  %s839_s8 = sshll.u32 %s1151_s16, 5  ;;  %vm715_vm5 = vcmp.lt.s32.totalorder %v618_v37, 256 }
  0x4f   : > { %875 = vmatpush3.msra.mxu1 %v289_v5  ;;  %864 = vmatpush3.msra.mxu0 %v203_v6  ;;  %v620_v43 = vsub.s32 %v617_v40, %v619_v41  ;;  %s200_s7 = scalar_lea.vmem [#allocation7], %s822_s4  ;;  %s731_s26 = scalar_lea.hbm %s1338_s3, %s839_s8 }
  0x50   : > { %876 = vmatprep.subr.mxu1 %v1101_v0  ;;  %865 = vmatprep.subr.mxu0 %v1101_v0  ;;  %v635_v47 = vsub.s32 %v632_v42, %v619_v41  ;;  %v700_v5 = vunpack.c.0.s8 %v699_v3  ;;  %s733_s9 = sshll.u32 %s200_s7, 4  ;;  %s719_s27 = scalar_lea.sflag [#allocation4], %s1237_s11  ;;  %s734_s9 = int_to_ptr.vmem [resolvable:$true] %s733_s9 }
  0x51   : > { %877 = vmatpush3.msra.mxu1 %v288_v7  ;;  %866 = vmatpush3.msra.mxu0 %v202_v8  ;;  %s1027_s18 = scalar_lea.vmem %s734_s9, 32  ;;  %p1354_p3 = scmp.ne.s32.totalorder %s1348_s6, 0 }
  0x52   : > { %879 = vmatmul.mubr.msk.f32.vlgmr.msra.gmra.mxu1 %vm213_vm1, %v201_v9  ;;  %868 = vmatmul.mubr.msk.f32.vlgmr.msra.gmra.mxu0 %vm213_vm1, %v201_v9  ;;  %p1028_p8 = scmp.ne.s32.totalorder %s734_s9, %s1027_s18  ;;  %s1109_s20 = smov [#allocation7]  }
  0x53   : > { %892 = vmatprep.subr.mxu1 %v1101_v0  ;;  %894 = vmatprep.mubr.msk.f32.mxu1 %vm1102_vm0, %v1101_v0  ;;  %s1031_s17 = sshll.u32 %s1109_s20, 4  ;;  %s1032_s17 = int_to_ptr.vmem [resolvable:$false] %s1031_s17 }
  0x54   : > { %881 = vmatprep.subr.mxu0 %v1101_v0  ;;  %889 = vmatprep.mubr.msk.f32.mxu0 %vm1102_vm0, %v1101_v0  ;;  %p1029_p11 = pnand %p1028_p8, %p1354_p3  ;;  %s1033_s16 = scalar_lea.vmem %s1032_s17, 64 }
  0x55   : > { %882 = vmatpush3.msra.mxu0 %v374_v10  ;;  %v703_v10 = vsub.s32 %v700_v5, %v619_v41  ;;  %p1034_p10 = scmp.lt.s32.totalorder %s734_s9, %s1032_s17  ;;  %p1035_p2 = scmp.lt.s32.totalorder %s1033_s16, %s1027_s18 }
  0x56   : > { %883 = vmatprep.subr.mxu0 %v1101_v0  ;;  %p1030_p7 = pneg %p1029_p11 }
  0x57   : > { %884 = vmatpush3.msra.mxu0 %v373_v11  ;;  %p1036_p13 = por %p1035_p2, %p1034_p10 }
  0x58   : > { %885 = vmatprep.subr.mxu0 %v1101_v0 }
  0x59   : > { %886 = vmatpush3.msra.mxu0 %v372_v12  ;;  %p1037_p0 = pnand %p1036_p13, %p1030_p7 }
  0x5a   : > { %887 = vmatprep.subr.mxu0 %v1101_v0 }
  0x5b   : > { %888 = vmatpush3.msra.mxu0 %v371_v13 }
  0x5c   : > { %890 = vmatmul.mubr.msk.f32.vlgmr.msra.gmra.mxu0 %vm213_vm1, %v201_v9 }
 0x112   : > { %v366_v16 = vpop.f32.mrf.mxu1  ;;  %v283_v17 = vpop.f32.mrf.mxu0 }
 0x113   : > { %v367_v18 = vadd.f32 %v826_v14, %v366_v16  ;;  %v284_v19 = vadd.f32 %v823_v15, %v283_v17 }
 0x114   : > { %v880_v20 = vpop.f32.mrf.mxu1  ;;  %v869_v21 = vpop.f32.mrf.mxu0 }
 0x115   : > { %893 = vmatpush3.xpose.msk.msra.mxu1 %vm213_vm1, %v367_v18 }
 0x116   : > { %897 = vmatprep.subr.mxu1 %v1101_v0 }
 0x118   : > { %895 = vmatmul.mubr.msk.f32.vlgmr.msra.gmra.mxu1 %vm213_vm1, %v284_v19 }
 0x119   : > { %899 = vmatprep.mubr.msk.f32.mxu1 %vm1102_vm0, %v1101_v0 }
 0x11c   : > { %v449_v26 = vpop.f32.mrf.mxu0 }
 0x11d   : > { %v450_v27 = vadd.f32 %v829_v25, %v449_v26 }
 0x11e   : > { %v891_v28 = vpop.f32.mrf.mxu0 }
 0x11f   : > { %898 = vmatpush3.msra.mxu1 %v450_v27 }
 0x1d8   : > { %v525_v22 = vpop.f32.mrf.mxu1 }
 0x1d9   : > { %v530_v23 = vsel %vm529_vm2, %v525_v22, -inf }
 0x1da   : > { %531 = vmax.xlane.f32.xlu0 %v530_v23  ;;  %v896_v24 = vpop.f32.mrf.mxu1 }
 0x263   : > { %v532_v29 = vpop.xlane.xlu0 %531 }
 0x264   : > { %v533_v30 = vsub.f32 %v525_v22, %v532_v29 }
 0x266   : > { %v534_v31 = vmul.f32 1.442695, %v533_v30 }
 0x268   : > { %969 = vpow2.f32 %v534_v31 }
 0x275   : > { %v970_v32 = vpop.eup %969 }
 0x276   : > { %900 = vmatmul.mubr.msk.f32.vlgmr.msra.gmra.mxu1 %vm529_vm2, %v970_v32  ;;  %v536_v33 = vsel %vm529_vm2, %v970_v32, 0.0 }
 0x277   : > { %537 = vadd.xlane.f32.xlu0 %v536_v33 }
 0x300   : > { %v538_v34 = vpop.xlane.xlu0 %537 }
 0x301   : > { %971 = vrcp.f32 %v538_v34 }
 0x30e   : > { %v972_v44 = vpop.eup %971 }
 0x336   : > { %v608_v45 = vpop.f32.mrf.mxu1 }
 0x337   : > { %v613_v46 = vmul.f32 %v972_v44, %v608_v45 }
 0x338   : > { %v901_v48 = vpop.f32.mrf.mxu1 }
 0x339   : > { %v614_v49 = vcombine.high %v613_v46, %v1101_v0  ;;  %v621_v50 = vrot.slane %v613_v46, %v620_v43 }
 0x33b   : > { %v628_v51 = vrot.slane %v614_v49, %v620_v43  ;;  %v629_v52 = vcombine.high %v621_v50, %v1101_v0  ;;  %v636_v53 = vrot.slane %v621_v50, %v635_v47 }
 0x33d   : > { %v659_v54 = vcombine.high %v636_v53, %v1101_v0  ;;  %v643_v55 = vrot.slane %v629_v52, %v635_v47  ;;  %v651_v56 = vrot.slane %v628_v51, %v635_v47  ;;  %v644_v58 = vcombine.high %v628_v51, %v1101_v0 }
 0x33f   : > { %664 = vrot.lane.b32.xlu1 %v659_v54, %s1105_s28  ;;  %668 = vrot.lane.b32.xlu0 %v643_v55, %s1106_s29  ;;  %v661_v57 = vcombine.high %v651_v56, %v1101_v0  ;;  %v658_v59 = vrot.slane %v644_v58, %v635_v47  ;;  %v660_v60 = vcombine.high %v643_v55, %v1101_v0 }
 0x341   : > { %v662_v61 = vcombine.high %v658_v59, %v1101_v0 }
 0x343   : > { %676 = vrot.lane.b32.xlu1 %v661_v57, %s1105_s28 }
 0x347   : > { %680 = vrot.lane.b32.xlu1 %v658_v59, %s1106_s29 }
 0x34b   : > { %672 = vrot.lane.b32.xlu1 %v660_v60, %s1107_s30 }
 0x34f   : > { %684 = vrot.lane.b32.xlu1 %v662_v61, %s1107_s30 }
 0x3b1   : > { %v665_v62 = vpop.permute.xlu1 %664  ;;  %v669_v7 = vpop.permute.xlu0 %668 }
 0x3b2   : > { %v687_v6 = vsel %vm213_vm1, %v636_v53, %v665_v62 }
 0x3b3   : > { %v689_v9 = vsel %vm688_vm3, %v687_v6, %v669_v7 }
 0x3b5   : > { %v677_v63 = vpop.permute.xlu1 %676 }
 0x3b6   : > { %v692_v8 = vsel %vm213_vm1, %v651_v56, %v677_v63 }
 0x3b9   : > { %v681_v1 = vpop.permute.xlu1 %680 }
 0x3ba   : > { %v693_v0 = vsel %vm688_vm3, %v692_v8, %v681_v1 }
 0x3bd   : > { %v673_v4 = vpop.permute.xlu1 %672 }
 0x3be   : > { %v691_v12 = vsel %vm690_vm4, %v689_v9, %v673_v4 }
 0x3c1   : > { %v685_v11 = vpop.permute.xlu1 %684 }
 0x3c2   : > { %v694_v13 = vsel %vm690_vm4, %v693_v0, %v685_v11 }
 0x3c3   : > { %v697_v14 = vcombine.low %v691_v12, %v694_v13 }
 0x3c5   : > { %v704_v15 = vrot.slane %v697_v14, %v703_v10 }
 0x3c7   : > { %v711_v16 = vrot.slane %v704_v15, %v703_v10 }
 0x3c9   : > { %717 = vst.msk [vmem:[%s200_s7] sm:$0x3] %vm715_vm5, %v711_v16 }
 0x3ca   : > { %1040 = shalt.err (!%p1037_p0)
}
 0x3cb   : > { %s1041_s22 = scalar_lea.hbm %s731_s26, 32  ;;  %s1045_s25 = scalar_lea.hbm %s1338_s3, 64 }
 0x3cc   : > { %p1042_p5 = scmp.ne.s32.totalorder %s731_s26, %s1041_s22  ;;  %p1046_p1 = scmp.lt.s32.totalorder %s731_s26, %s1338_s3 }
 0x3cd   : > { %p1047_p4 = scmp.lt.s32.totalorder %s1045_s25, %s1041_s22 }
 0x3ce   : > { %p1043_p9 = pnand %p1042_p5, %p1354_p3 }
 0x3cf   : > { %p1048_p6 = por %p1047_p4, %p1046_p1 }
 0x3d0   : > { %p1044_p12 = pneg %p1043_p9 }
 0x3d2   : > { %p1049_p8 = pnand %p1048_p6, %p1044_p12 }
 0x3d4   : > { %1052 = shalt.err (!%p1049_p8)
}
 0x3d5   : > { %908 = dma.vmem_to_hbm [thread:$0]  (%p1354_p3), %s734_s9, 32, %s731_s26, %s719_s27  }
 0x3d6 PF: > { %s745_s30 = sand.u32 1, %s1083_s12   ;;  %p1355_p11 = scmp.ne.s32.totalorder %s1344_s19, 0 }
 0x3d7   : > { %p1356_p7 = scmp.ge.s32.totalorder %s1095_s15, 2  ;;  %s746_s4 = scalar_lea.sflag [#allocation4], %s745_s30 }
 0x3d9   : > { %p919_p10 = pnand %p1356_p7, %p1355_p11 }
 0x3db   : > { %p920_p2 = pneg %p919_p10 }
 0x3dd   : > { %1078 = dma.done.wait (%p920_p2), %s746_s4, 32  }
 0x3de   : > { %1080 = vsyncadd (%p920_p2), %s746_s4, 4294967264  ;;  %p17_p13 = scmp.ge.s32.totalorder %s1184_s24, 4   ;;  %s1357_s12 = smov %s1087_s13 }
 0x3df   : > { %s1358_s13 = smov %s1091_s14  ;;  %s1359_s14 = smov %s1201_s5 }
 0x3e0   : > { %s1360_s15 = smov %s1184_s24  ;;  %19 = sbr.rel (!%p17_p13) target bundleno = 6 (0x6), region = 85 }
 0x3e5   :  { %751 = vsyncpa [#allocation3], 1 }
 0x3e6   :  { %753 = vsyncpa [#allocation3 + $0x1], 1 }
 0x3e7   :  { %754 = vsyncpa [#allocation6], 1 }
 0x3e8   :  { %755 = vsyncpa [#allocation4], 1 }
 0x3e9   :  { %757 = vsyncpa [#allocation4 + $0x1], 1 }

</bundles_post_ra>
